<compile_context>
chip_gen: v5e
topology: v5e:2x2
jax: 0.10.0
libtpu: 0.0.40
codegen_flags: <defaults>
</compile_context>

<pallas_src>
import functools

import jax
import jax.numpy as jnp
from jax.experimental import pallas as pl
from jax.experimental.pallas import tpu as pltpu

KH = KW = 3                    # kernel_size=3, stride=1, padding=1, dilation=1
M_TARGET = 256                 # target matmul rows per grid step (fills v6e/v7x MXU)
X_BLOCK_BYTES_CAP = 8 << 20    # keep the streamed input block modest in VMEM


def dbl_kernel(x_ref, w_ref, shift_ref, alpha_ref, o_ref):
    """One batch-tile per grid step: single MXU matmul + VPU epilogue.

    x_ref     : (MB, K)   kh-pre-shifted padded input rows, K = KH*(W+2)*Cin
    w_ref     : (K, WC)   banded conv weight with BN scale folded in, WC = W*Cout
    shift_ref : (1, WC)   folded BN shift (+ conv bias), f32
    alpha_ref : (1,)      SMEM PReLU slope (single shared parameter)
    o_ref     : (MB, WC)  lane-dense output block
    """
    acc = jnp.dot(x_ref[...], w_ref[...], preferred_element_type=jnp.float32)
    y = acc + shift_ref[...]                 # BN shift (+ conv bias); scale is in w
    alpha = alpha_ref[0]                     # SMEM scalar
    y = jnp.where(y >= 0, y, alpha * y)      # PReLU (shared alpha)
    # Dropout(p=0.3) is the identity in inference mode.
    o_ref[...] = y.astype(o_ref.dtype)


def _banded_weight(w_oihw, W):
    """(Cout, Cin, KH, KW) -> (KH, (W+2)*Cin, W*Cout) banded matrix.

    B[kh, p*Cin + ci, w*Cout + co] = w[co, ci, kh, p - w] if 0 <= p - w < KW else 0
    """
    Cout, Cin, _, _ = w_oihw.shape
    Wp = W + 2
    w_hw = jnp.transpose(w_oihw, (2, 3, 1, 0))                 # (KH, KW, Cin, Cout)
    sel = (jnp.arange(Wp)[None, :, None] ==
           (jnp.arange(W)[None, None, :] + jnp.arange(KW)[:, None, None])
           ).astype(w_hw.dtype)                                # (KW, Wp, W)
    B = jnp.einsum("apw,kaio->kpiwo", sel, w_hw)               # (KH, Wp, Cin, W, Cout)
    return B.reshape(KH, Wp * Cin, W * Cout)


def dbl_prepare_params(w_oihw, bias, gamma, beta, run_mean, run_var, alpha,
                       W, eps=1e-5, matmul_dtype=jnp.bfloat16):
    """Model-load-time constant folding. Call ONCE, reuse across forward calls."""
    Cout, Cin, kh, kw = w_oihw.shape
    assert (kh, kw) == (KH, KW)
    g_inv_std = (gamma / jnp.sqrt(run_var + eps)).astype(jnp.float32)
    # Fold the BN scale into the conv weight in f32 BEFORE any bf16 cast.
    w_scaled = w_oihw.astype(jnp.float32) * g_inv_std[:, None, None, None]
    K = KH * (W + 2) * Cin
    w_band = _banded_weight(w_scaled, W).reshape(K, W * Cout).astype(matmul_dtype)
    shift = jnp.tile(beta + (bias - run_mean) * g_inv_std, W)   # (W*Cout,)
    shift = shift.reshape(1, W * Cout).astype(jnp.float32)
    alpha_arr = jnp.asarray(alpha, jnp.float32).reshape(1)
    return w_band, shift, alpha_arr


def _choose_batch_tile(N, H, K, itemsize):
    """Largest divisor NB of N with NB*H >= M_TARGET (when possible), VMEM-capped."""
    nb = max(1, min(N, pl.cdiv(M_TARGET, H)))
    while nb > 1 and nb * H * K * itemsize > X_BLOCK_BYTES_CAP:
        nb -= 1
    while N % nb:
        nb -= 1
    return nb


@functools.partial(jax.jit, static_argnames=("out_dtype",))
def dbl_apply(x_nchw, w_band, shift, alpha_arr, out_dtype=jnp.float32):
    """Per-call path: input layout prep + pallas_call + layout back to NCHW."""
    N, Cin, H, W = x_nchw.shape
    Hp = H + 2
    WC = shift.shape[1]
    Cout = WC // W
    K = w_band.shape[0]
    assert K == KH * (W + 2) * Cin
    # Keep stores lane-dense / blocks (8,128)-aligned; other shapes need padding.
    assert H % 8 == 0 and WC % 128 == 0

    # --- glue: NCHW -> padded NHWC with the KH row-shifted slabs pre-staged on
    # the lane axis, so the kernel does a single dense matmul per row slab. ---
    x_nhwc = jnp.transpose(x_nchw, (0, 2, 3, 1))
    x_pad = jnp.pad(x_nhwc, ((0, 0), (1, 1), (1, 1), (0, 0)))      # (N, Hp, Wp, Cin)
    x_flat = x_pad.reshape(N, Hp, (W + 2) * Cin).astype(w_band.dtype)
    x_shift = jnp.concatenate([x_flat[:, kh:kh + H, :] for kh in range(KH)],
                              axis=-1)                             # (N, H, K)
    x_rows = x_shift.reshape(N * H, K)                             # M-major, lane = K

    NB = _choose_batch_tile(N, H, K, x_rows.dtype.itemsize)
    MB = NB * H
    grid = (N // NB,)

    out_rows = pl.pallas_call(
        dbl_kernel,
        out_shape=jax.ShapeDtypeStruct((N * H, WC), out_dtype),
        grid_spec=pltpu.PrefetchScalarGridSpec(
            num_scalar_prefetch=0,
            grid=grid,
            in_specs=[
                pl.BlockSpec((MB, K), lambda n: (n, 0)),
                pl.BlockSpec((K, WC), lambda n: (0, 0)),
                pl.BlockSpec((1, WC), lambda n: (0, 0)),
                pl.BlockSpec(memory_space=pltpu.MemorySpace.SMEM),
            ],
            out_specs=pl.BlockSpec((MB, WC), lambda n: (n, 0)),
        ),
        compiler_params=pltpu.CompilerParams(
            dimension_semantics=("parallel",)),
    )(x_rows, w_band, shift, alpha_arr)

    # (N*H, W*Cout) already has NHWC layout; the final transpose exists only to
    # match the PyTorch module's NCHW output (skip it if the consumer allows).
    return jnp.transpose(out_rows.reshape(N, H, W, Cout), (0, 3, 1, 2))


def ref_forward(x_nchw, w_oihw, bias, gamma, beta, run_mean, run_var, alpha,
                eps=1e-5):
    y = jax.lax.conv_general_dilated(
        x_nchw, w_oihw, window_strides=(1, 1), padding=((1, 1), (1, 1)),
        dimension_numbers=("NCHW", "OIHW", "NCHW"))
    y = y + bias[None, :, None, None]
    y = (y - run_mean[None, :, None, None]) / jnp.sqrt(
        run_var[None, :, None, None] + eps)
    y = y * gamma[None, :, None, None] + beta[None, :, None, None]
    return jnp.where(y >= 0, y, alpha * y)


if __name__ == "__main__":
    # Small shapes consistent with the module (inputfeatures -> output channels);
    # W * Cout = 128 keeps the output block exactly one lane-tile wide.
    N, Cin, H, W = 2, 4, 16, 16
    Cout = 8

    key = jax.random.PRNGKey(0)
    kx, kw, kb, kg, kbe, km, kv = jax.random.split(key, 7)

    x = jax.random.normal(kx, (N, Cin, H, W), jnp.float32)
    w = jax.random.normal(kw, (Cout, Cin, KH, KW), jnp.float32) * 0.1
    bias = jax.random.normal(kb, (Cout,), jnp.float32) * 0.1
    gamma = 1.0 + 0.1 * jax.random.normal(kg, (Cout,), jnp.float32)
    beta = 0.1 * jax.random.normal(kbe, (Cout,), jnp.float32)
    run_mean = 0.1 * jax.random.normal(km, (Cout,), jnp.float32)
    run_var = jnp.abs(1.0 + 0.1 * jax.random.normal(kv, (Cout,), jnp.float32))
    alpha = jnp.float32(0.25)  # PReLU init=0.25

    ref = ref_forward(x, w, bias, gamma, beta, run_mean, run_var, alpha)

    # f32 MXU operands: tight-tolerance correctness check.
    params_f32 = dbl_prepare_params(w, bias, gamma, beta, run_mean, run_var,
                                    alpha, W=W, matmul_dtype=jnp.float32)
    out_f32 = jax.block_until_ready(dbl_apply(x, *params_f32))
    assert out_f32.shape == (N, Cout, H, W)
    assert jnp.allclose(out_f32, ref, atol=1e-3, rtol=1e-3)

    # bf16 MXU operands (f32 accumulate / f32 epilogue): production fast path
    # on all generations (f32 operands lower to a multi-pass bf16 decomposition).
    params_bf16 = dbl_prepare_params(w, bias, gamma, beta, run_mean, run_var,
                                     alpha, W=W, matmul_dtype=jnp.bfloat16)
    out_bf16 = jax.block_until_ready(dbl_apply(x, *params_bf16))
    assert out_bf16.shape == (N, Cout, H, W)
    assert jnp.allclose(out_bf16, ref, atol=5e-2, rtol=5e-2)

    print("KERNEL_OK")
</pallas_src>

<mosaic_0001>
module attributes {stable_mosaic.version = 11 : i64} {
  func.func @dbl_kernel(%arg0: i32, %arg1: memref<32x216xf32, #tpu.memory_space<vmem>>, %arg2: memref<216x128xf32, #tpu.memory_space<vmem>>, %arg3: memref<1x128xf32, #tpu.memory_space<vmem>>, %arg4: memref<1xf32, #tpu.memory_space<smem>>, %arg5: memref<32x128xf32, #tpu.memory_space<vmem>>) attributes {dimension_semantics = [#tpu.dimension_semantics<parallel>], iteration_bounds = array<i64: 1>, scalar_prefetch = 0 : i64, scratch_operands = 0 : i64, tpu.core_type = #tpu.core_type<tc>, window_params = [{transform_indices = @transform_0, window_bounds = array<i64: 32, 216>}, {pipeline_mode = #tpu.pipeline_mode<synchronous>, transform_indices = @transform_1, window_bounds = array<i64: 216, 128>}, {pipeline_mode = #tpu.pipeline_mode<synchronous>, transform_indices = @transform_2, window_bounds = array<i64: 1, 128>}, {transform_indices = @transform_3, window_bounds = array<i64: 1>}, {transform_indices = @transform_4, window_bounds = array<i64: 32, 128>}]} {
    %c0 = arith.constant 0 : index
    %c0_0 = arith.constant 0 : index
    %0 = vector.load %arg1[%c0, %c0_0] : memref<32x216xf32, #tpu.memory_space<vmem>>, vector<32x216xf32>
    %c0_1 = arith.constant 0 : index
    %c0_2 = arith.constant 0 : index
    %1 = vector.load %arg2[%c0_1, %c0_2] : memref<216x128xf32, #tpu.memory_space<vmem>>, vector<216x128xf32>
    %cst = arith.constant dense<0.000000e+00> : vector<32x128xf32>
    %2 = tpu.matmul %0, %1, %cst {dimension_numbers = #tpu.dot_dimension_numbers<[1], [0], [0], [1], [0, 0, 1, 1], [], []>} : vector<32x216xf32>, vector<216x128xf32>, vector<32x128xf32> -> vector<32x128xf32>
    %c0_3 = arith.constant 0 : index
    %c0_4 = arith.constant 0 : index
    %3 = vector.load %arg3[%c0_3, %c0_4] : memref<1x128xf32, #tpu.memory_space<vmem>>, vector<1x128xf32>
    %4 = vector.broadcast %3 : vector<1x128xf32> to vector<32x128xf32>
    %5 = arith.addf %2, %4 : vector<32x128xf32>
    %c0_5 = arith.constant 0 : index
    %6 = memref.load %arg4[%c0_5] : memref<1xf32, #tpu.memory_space<smem>>
    %cst_6 = arith.constant 0.000000e+00 : f32
    %7 = vector.broadcast %cst_6 : f32 to vector<32x128xf32>
    %8 = arith.cmpf oge, %5, %7 : vector<32x128xf32>
    %9 = vector.broadcast %6 : f32 to vector<32x128xf32>
    %10 = arith.mulf %9, %5 : vector<32x128xf32>
    %11 = arith.select %8, %5, %10 : vector<32x128xi1>, vector<32x128xf32>
    %c0_7 = arith.constant 0 : index
    %c0_8 = arith.constant 0 : index
    %12 = vector.load %arg5[%c0_7, %c0_8] : memref<32x128xf32, #tpu.memory_space<vmem>>, vector<32x128xf32>
    tpu.vector_store %arg5[%c0_7, %c0_8], %11 {strides = array<i32>} : memref<32x128xf32, #tpu.memory_space<vmem>>, vector<32x128xf32>,
    return
  }
  func.func @transform_0(%arg0: i32) -> (i32, i32) {
    %c0_i32 = arith.constant 0 : i32
    %c0_i32_0 = arith.constant 0 : i32
    return %arg0, %c0_i32 : i32, i32
  }
  func.func @transform_1(%arg0: i32) -> (i32, i32) {
    %c0_i32 = arith.constant 0 : i32
    %c0_i32_0 = arith.constant 0 : i32
    %c0_i32_1 = arith.constant 0 : i32
    return %c0_i32, %c0_i32_0 : i32, i32
  }
  func.func @transform_2(%arg0: i32) -> (i32, i32) {
    %c0_i32 = arith.constant 0 : i32
    %c0_i32_0 = arith.constant 0 : i32
    %c0_i32_1 = arith.constant 0 : i32
    return %c0_i32, %c0_i32_0 : i32, i32
  }
  func.func @transform_3(%arg0: i32) -> i32 {
    %c0_i32 = arith.constant 0 : i32
    %c0_i32_0 = arith.constant 0 : i32
    return %c0_i32 : i32
  }
  func.func @transform_4(%arg0: i32) -> (i32, i32) {
    %c0_i32 = arith.constant 0 : i32
    %c0_i32_0 = arith.constant 0 : i32
    return %arg0, %c0_i32 : i32, i32
  }
}

</mosaic_0001>

<bundles_post_ra>
// kernel: dbl_apply.1
= control target key start
LH: loop header
LB: loop body
LE: loop exit
PB: predicated region body
PF: predicated region fallthrough
CT: control target
= control target key end

     0   :  { %vm57_vm0 = vcmask 719872   ;;  %s339_s1 = inlined_call_operand.vmem [shape: f32[216,128], index: 1, kind: input, shape index: {}]   ;;  %s340_s0 = inlined_call_operand.vmem [shape: f32[32,216], index: 0, kind: input, shape index: {}]   ;;  %s341_s2 = inlined_call_operand.vmem [shape: f32[1,128], index: 2, kind: input, shape index: {}]   ;;  %s342_s3 = inlined_call_operand.<no memory space> [shape: f32[1], index: 3, kind: input, shape index: {}]   ;;  %s343_s4 = inlined_call_operand.vmem [shape: f32[32,128], index: 4, kind: output, shape index: {}]  }
   0x1   :  { %v41_v0 = vld [vmem:[%s339_s1 + $0x78] sm:$0xff]  ;;  %v40_v1 = vld [vmem:[%s339_s1 + $0x70] sm:$0xff]  ;;  %v51_v3 = vld [vmem:[%s339_s1 + $0xc8] sm:$0xff]  ;;  %v133_v39 = vstv %s342_s3 }
   0x2   :  { %v52_v2 = vld [vmem:[%s339_s1 + $0xd0] sm:$0xff]  ;;  %70 = vmatpush.msra.mxu0 %v41_v0  ;;  %154 = vmatpush.msra.mxu2 %v41_v0  ;;  %v39_v4 = vld [vmem:[%s339_s1 + $0x68] sm:$0xff]  ;;  %v50_v5 = vld [vmem:[%s339_s1 + $0xc0] sm:$0xff] }
   0x3   :  { %155 = vmatpush.msra.mxu3 %v41_v0  ;;  %104 = vmatpush.msra.mxu1 %v52_v2  ;;  %v38_v6 = vld [vmem:[%s339_s1 + $0x60] sm:$0xff]  ;;  %v49_v7 = vld [vmem:[%s339_s1 + $0xb8] sm:$0xff]  ;;  %v48_v9 = vld [vmem:[%s339_s1 + $0xb0] sm:$0xff] }
   0x4   :  { %71 = vmatpush.msra.mxu0 %v40_v1  ;;  %156 = vmatpush.msra.mxu2 %v40_v1  ;;  %v37_v8 = vld [vmem:[%s339_s1 + $0x58] sm:$0xff]  ;;  %v36_v10 = vld [vmem:[%s339_s1 + $0x50] sm:$0xff]  ;;  %v47_v11 = vld [vmem:[%s339_s1 + $0xa8] sm:$0xff] }
   0x5   :  { %157 = vmatpush.msra.mxu3 %v40_v1  ;;  %105 = vmatpush.msra.mxu1 %v51_v3  ;;  %v35_v12 = vld [vmem:[%s339_s1 + $0x48] sm:$0xff]  ;;  %v46_v13 = vld [vmem:[%s339_s1 + $0xa0] sm:$0xff]  ;;  %v45_v15 = vld [vmem:[%s339_s1 + $0x98] sm:$0xff] }
   0x6   :  { %72 = vmatpush.msra.mxu0 %v39_v4  ;;  %158 = vmatpush.msra.mxu2 %v39_v4  ;;  %v34_v14 = vld [vmem:[%s339_s1 + $0x40] sm:$0xff]  ;;  %v33_v16 = vld [vmem:[%s339_s1 + $0x38] sm:$0xff]  ;;  %v44_v17 = vld [vmem:[%s339_s1 + $0x90] sm:$0xff] }
   0x7   :  { %159 = vmatpush.msra.mxu3 %v39_v4  ;;  %106 = vmatpush.msra.mxu1 %v50_v5  ;;  %v32_v18 = vld [vmem:[%s339_s1 + $0x30] sm:$0xff]  ;;  %v43_v19 = vld [vmem:[%s339_s1 + $0x88] sm:$0xff]  ;;  %v42_v21 = vld [vmem:[%s339_s1 + $0x80] sm:$0xff] }
   0x8   :  { %73 = vmatpush.msra.mxu0 %v38_v6  ;;  %160 = vmatpush.msra.mxu2 %v38_v6  ;;  %v31_v20 = vld [vmem:[%s339_s1 + $0x28] sm:$0xff]  ;;  %v30_v22 = vld [vmem:[%s339_s1 + $0x20] sm:$0xff]  ;;  %v29_v24 = vld [vmem:[%s339_s1 + $0x18] sm:$0xff] }
   0x9   :  { %161 = vmatpush.msra.mxu3 %v38_v6  ;;  %107 = vmatpush.msra.mxu1 %v49_v7  ;;  %v19_v23 = vld [vmem:[%s340_s0 + $0x8] sm:$0xff]  ;;  %v28_v25 = vld [vmem:[%s339_s1 + $0x10] sm:$0xff]  ;;  %v26_v27 = vld [vmem:[%s339_s1] sm:$0xff] }
   0xa   :  { %74 = vmatpush.msra.mxu0 %v37_v8  ;;  %162 = vmatpush.msra.mxu2 %v37_v8  ;;  %v27_v26 = vld [vmem:[%s339_s1 + $0x8] sm:$0xff]  ;;  %v18_v28 = vld [vmem:[%s340_s0] sm:$0xff]  ;;  %v20_v29 = vld [vmem:[%s340_s0 + $0x10] sm:$0xff] }
   0xb   :  { %163 = vmatpush.msra.mxu3 %v37_v8  ;;  %108 = vmatpush.msra.mxu1 %v48_v9  ;;  %v22_v30 = vld [vmem:[%s340_s0 + $0x20] sm:$0xff]  ;;  %v21_v31 = vld [vmem:[%s340_s0 + $0x18] sm:$0xff]  ;;  %v24_v32 = vld [vmem:[%s340_s0 + $0x30] sm:$0xff] }
   0xc   :  { %75 = vmatpush.msra.mxu0 %v36_v10  ;;  %164 = vmatpush.msra.mxu2 %v36_v10  ;;  %v23_v33 = vld [vmem:[%s340_s0 + $0x28] sm:$0xff]  ;;  %v25_v34 = vld [vmem:[%s340_s0 + $0x38] sm:$0xff]  ;;  %v186_v36 = vld [vmem:[%s341_s2] ss:$0 sm:$0xff] }
   0xd   :  { %165 = vmatpush.msra.mxu3 %v36_v10  ;;  %109 = vmatpush.msra.mxu1 %v47_v11 }
   0xe   :  { %76 = vmatpush.msra.mxu0 %v35_v12  ;;  %166 = vmatpush.msra.mxu2 %v35_v12 }
   0xf   :  { %167 = vmatpush.msra.mxu3 %v35_v12  ;;  %110 = vmatpush.msra.mxu1 %v46_v13 }
  0x10   :  { %77 = vmatpush.msra.mxu0 %v34_v14  ;;  %168 = vmatpush.msra.mxu2 %v34_v14 }
  0x11   :  { %169 = vmatpush.msra.mxu3 %v34_v14  ;;  %111 = vmatpush.msra.mxu1 %v45_v15 }
  0x12   :  { %78 = vmatpush.msra.mxu0 %v33_v16  ;;  %170 = vmatpush.msra.mxu2 %v33_v16 }
  0x13   :  { %171 = vmatpush.msra.mxu3 %v33_v16  ;;  %112 = vmatpush.msra.mxu1 %v44_v17 }
  0x14   :  { %79 = vmatpush.msra.mxu0 %v32_v18  ;;  %172 = vmatpush.msra.mxu2 %v32_v18 }
  0x15   :  { %173 = vmatpush.msra.mxu3 %v32_v18  ;;  %113 = vmatpush.msra.mxu1 %v43_v19 }
  0x16   :  { %80 = vmatpush.msra.mxu0 %v31_v20  ;;  %174 = vmatpush.msra.mxu2 %v31_v20 }
  0x17   :  { %175 = vmatpush.msra.mxu3 %v31_v20  ;;  %114 = vmatpush.msra.mxu1 %v42_v21 }
  0x18   :  { %81 = vmatpush.msra.mxu0 %v30_v22  ;;  %176 = vmatpush.msra.mxu2 %v30_v22 }
  0x19   :  { %177 = vmatpush.msra.mxu3 %v30_v22  ;;  %150 = vmatmul.msk.f32.vlgmr.msra.gmra.mxu1 %vm57_vm0, %v19_v23 }
  0x1a   :  { %82 = vmatpush.msra.mxu0 %v29_v24  ;;  %178 = vmatpush.msra.mxu2 %v29_v24 }
  0x1b   :  { %179 = vmatpush.msra.mxu3 %v29_v24 }
  0x1c   :  { %83 = vmatpush.msra.mxu0 %v28_v25  ;;  %180 = vmatpush.msra.mxu2 %v28_v25 }
  0x1d   :  { %181 = vmatpush.msra.mxu3 %v28_v25 }
  0x1e   :  { %84 = vmatpush.msra.mxu0 %v27_v26  ;;  %182 = vmatpush.msra.mxu2 %v27_v26 }
  0x1f   :  { %183 = vmatpush.msra.mxu3 %v27_v26 }
  0x20   :  { %85 = vmatpush.msra.mxu0 %v26_v27  ;;  %184 = vmatpush.msra.mxu2 %v26_v27 }
  0x21   :  { %185 = vmatpush.msra.mxu3 %v26_v27  ;;  %86 = vmatmul.f32.vlgmr.msra.gmra.mxu0 %v18_v28 }
  0x22   :  { %89 = vmatmul.f32.vlgmr.msra.gmra.mxu2 %v20_v29  ;;  %92 = vmatmul.f32.vlgmr.msra.gmra.mxu3 %v22_v30 }
  0x23   :  { %151 = vmatmul.msk.f32.gmra.mxu1 %vm57_vm0, %v21_v31 }
  0x2a   :  { %95 = vmatmul.f32.gmra.mxu3 %v24_v32 }
  0x2b   :  { %152 = vmatmul.msk.f32.gmra.mxu1 %vm57_vm0, %v23_v33 }
  0x33   :  { %153 = vmatmul.msk.f32.gmra.mxu1 %vm57_vm0, %v25_v34 }
  0x96   :  { %v116_v35 = vpop.f32.mrf.mxu1 }
  0x9e   :  { %v87_v37 = vpop.f32.mrf.mxu0 }
  0x9f   :  { %v88_v38 = vadd.f32 %v186_v36, %v87_v37 }
  0xa0   :  { %v119_v40 = vpop.f32.mrf.mxu1 }
  0xa1   :  { %v117_v41 = vadd.f32 %v116_v35, %v88_v38 }
  0xa3   :  { %vm129_vm1 = vcmp.ge.f32.partialorder %v117_v41, 0.0  ;;  %v134_v42 = vmul.f32 %v133_v39, %v117_v41 }
  0xa5   :  { %v138_v43 = vsel %vm129_vm1, %v117_v41, %v134_v42  ;;  %v90_v44 = vpop.f32.mrf.mxu2  ;;  %v93_v45 = vpop.f32.mrf.mxu3 }
  0xa6   :  { %142 = vst [vmem:[%s343_s4] sm:$0xff] %v138_v43  ;;  %v91_v46 = vadd.f32 %v186_v36, %v90_v44  ;;  %v94_v47 = vadd.f32 %v186_v36, %v93_v45 }
  0xa8   :  { %v120_v48 = vadd.f32 %v119_v40, %v91_v46  ;;  %v122_v49 = vpop.f32.mrf.mxu1 }
  0xa9   :  { %v123_v50 = vadd.f32 %v122_v49, %v94_v47 }
  0xaa   :  { %vm130_vm2 = vcmp.ge.f32.partialorder %v120_v48, 0.0  ;;  %v135_v51 = vmul.f32 %v133_v39, %v120_v48 }
  0xab   :  { %vm131_vm3 = vcmp.ge.f32.partialorder %v123_v50, 0.0  ;;  %v136_v52 = vmul.f32 %v133_v39, %v123_v50 }
  0xac   :  { %v139_v53 = vsel %vm130_vm2, %v120_v48, %v135_v51 }
  0xad   :  { %143 = vst [vmem:[%s343_s4 + $0x8] sm:$0xff] %v139_v53  ;;  %v140_v54 = vsel %vm131_vm3, %v123_v50, %v136_v52  ;;  %v96_v55 = vpop.f32.mrf.mxu3 }
  0xae   :  { %144 = vst [vmem:[%s343_s4 + $0x10] sm:$0xff] %v140_v54  ;;  %v97_v56 = vadd.f32 %v186_v36, %v96_v55 }
  0xb0   :  { %v125_v57 = vpop.f32.mrf.mxu1 }
  0xb1   :  { %v126_v58 = vadd.f32 %v125_v57, %v97_v56 }
  0xb3   :  { %vm132_vm4 = vcmp.ge.f32.partialorder %v126_v58, 0.0  ;;  %v137_v59 = vmul.f32 %v133_v39, %v126_v58 }
  0xb5   :  { %v141_v60 = vsel %vm132_vm4, %v126_v58, %v137_v59 }
  0xb6   :  { %145 = vst [vmem:[%s343_s4 + $0x18] sm:$0xff] %v141_v60 }

</bundles_post_ra>
